<compile_context>
chip_gen: v5e
topology: v5e:2x2
jax: 0.10.0
libtpu: 0.0.40
codegen_flags: <defaults>
</compile_context>

<pallas_src>
import functools

import jax
import jax.numpy as jnp
from jax import lax
from jax.experimental import pallas as pl
from jax.experimental.pallas import tpu as pltpu


def _avg_pool_mask_kernel(x_ref, m_ref, o_ref, den_acc, *, seq_len, seq_tile, ragged):
    # x_ref  : (TB, TL, TH) native-dtype tensor tile
    # m_ref  : (TB, TL)     f32 0/1 mask tile, lane-dense
    # o_ref  : (TB, TH)     f32 output block, resident across the k (seq) axis
    # den_acc: (TB, 1)      f32 running count of valid positions
    k = pl.program_id(2)

    @pl.when(k == 0)
    def _init():
        o_ref[...] = jnp.zeros_like(o_ref)
        den_acc[...] = jnp.zeros_like(den_acc)

    x = x_ref[...]
    m = m_ref[...]

    if ragged:
        # The last seq block overhangs L: the overhanging region of BOTH tiles
        # holds uninitialized VMEM (possibly NaN).  Zero both so garbage can
        # never reach the accumulators (0 * NaN == NaN otherwise).  Same-shape
        # iota/compare/select only -- no relayouts.
        limit = seq_len - k * seq_tile
        m = jnp.where(lax.broadcasted_iota(jnp.int32, m.shape, 1) < limit, m, 0.0)
        x = jnp.where(lax.broadcasted_iota(jnp.int32, x.shape, 1) < limit,
                      x, jnp.zeros((), x.dtype))

    # Lane->sublane relayout of the small f32 mask (XLU; the big tensor tile
    # is never relaid out), then a broadcast multiply along the minor dim.
    m3 = m[:, :, None]                                        # (TB, TL, 1) f32
    o_ref[...] += jnp.sum(x.astype(jnp.float32) * m3, axis=1)  # (TB, TH) masked partial sum
    den_acc[...] += jnp.sum(m, axis=1, keepdims=True)          # (TB, 1) valid-count partial

    @pl.when(k == pl.num_programs(2) - 1)
    def _finalize():
        # Exact reciprocal on the EUP; den == 0 rows give inf/NaN exactly like
        # the PyTorch module.
        o_ref[...] = o_ref[...] * pl.reciprocal(den_acc[...], approx=False)


def _cdiv(a, b):
    return (a + b - 1) // b


def _pick_tiles(B, L, H, itemsize, per_buffer_bytes):
    # Batch tile: only sublane-constrained through the mask/output blocks, so
    # it must be a multiple of 8 or exactly B.
    TB = B if B <= 8 else 8

    # Seq tile: exactly L, or a multiple of 128 (lane-dense mask block, and a
    # multiple of every dtype's sublane packing for the tensor block).
    if TB * L * H * itemsize <= per_buffer_bytes:
        TL = L
    else:
        TL = (per_buffer_bytes // (TB * H * itemsize)) // 128 * 128
        TL = max(128, TL)
        TL = min(TL, _cdiv(L, 128) * 128)

    # Grow TB (multiples of 8) when the per-step slab is small (short L /
    # narrow H), but keep >= 2 batch blocks so both v7x TensorCores get work.
    if B > 8 and TL == L:
        while (TB + 8 <= 64
               and _cdiv(B, TB + 8) >= 2
               and (TB + 8) * TL * H * itemsize <= per_buffer_bytes):
            TB += 8

    # Hidden tile: keep H whole unless it blows the budget, in which case use
    # lane-dense 128-multiples.
    TH = H
    if TB * TL * TH * itemsize > per_buffer_bytes and H > 128:
        TH = max(128, (per_buffer_bytes // (TB * TL * itemsize)) // 128 * 128)
        TH = min(TH, H)
    # v7x: if the batch axis alone cannot feed two TensorCores, split H.
    if _cdiv(B, TB) < 2 and TH == H and H % 256 == 0:
        TH = H // 2
    return TB, TL, TH


def avg_pool_with_mask(tensor, mask, *, per_buffer_bytes=None, vmem_limit_bytes=None):
    """tensor: [B, L, H] (any float dtype), mask: [B, L] 0/1 -> [B, H] float32."""
    B, L, H = tensor.shape
    if mask.ndim == 3:
        mask = mask.reshape(B, L)
    itemsize = jnp.dtype(tensor.dtype).itemsize

    # Per-generation VMEM gate: tiles sized for v5e/v6e's 128 MiB must also
    # fit v7x's 64 MiB physical VMEM.
    try:
        vmem_cap = int(pltpu.get_tpu_info().vmem_capacity_bytes)
    except Exception:
        vmem_cap = 64 * 1024 * 1024  # conservative (v7x physical)
    if per_buffer_bytes is None:
        per_buffer_bytes = 6 * 1024 * 1024 if vmem_cap >= 96 * 1024 * 1024 \
            else 3 * 1024 * 1024

    TB, TL, TH = _pick_tiles(B, L, H, itemsize, per_buffer_bytes)

    if vmem_limit_bytes is None:
        # double-buffered tensor + mask tiles, output block, scratch, headroom
        est = (2 * TB * TL * TH * itemsize
               + 2 * TB * max(TL, 128) * 4
               + 2 * TB * max(TH, 128) * 4
               + 8 * 128 * 4)
        vmem_limit_bytes = min(max(2 * est, 16 * 1024 * 1024), 48 * 1024 * 1024)

    mask_f = mask.astype(jnp.float32)        # (B, L): tiny next to the tensor
    grid = (_cdiv(B, TB), _cdiv(H, TH), _cdiv(L, TL))
    ragged = (L % TL) != 0

    kernel = functools.partial(
        _avg_pool_mask_kernel, seq_len=L, seq_tile=TL, ragged=ragged)

    return pl.pallas_call(
        kernel,
        out_shape=jax.ShapeDtypeStruct((B, H), jnp.float32),
        grid_spec=pltpu.PrefetchScalarGridSpec(
            num_scalar_prefetch=0,
            grid=grid,
            in_specs=[
                pl.BlockSpec((TB, TL, TH), lambda b, h, k: (b, k, h)),
                pl.BlockSpec((TB, TL), lambda b, h, k: (b, k)),
            ],
            out_specs=pl.BlockSpec((TB, TH), lambda b, h, k: (b, h)),
            scratch_shapes=[pltpu.VMEM((TB, 1), jnp.float32)],  # denominator
        ),
        compiler_params=pltpu.CompilerParams(
            dimension_semantics=("parallel", "parallel", "arbitrary"),
            vmem_limit_bytes=int(vmem_limit_bytes),
        ),
    )(tensor, mask_f)


def _reference(tensor, mask):
    mf = mask.astype(jnp.float32)[:, :, None]
    return (jnp.sum(tensor.astype(jnp.float32) * mf, axis=1)
            / jnp.sum(mf, axis=1))


if __name__ == "__main__":
    key = jax.random.PRNGKey(0)
    k1, k2 = jax.random.split(key)

    # --- test 1: small f32, single tile --------------------------------
    B, L, H = 2, 8, 32
    x = jax.random.normal(k1, (B, L, H), dtype=jnp.float32)
    lens = jnp.array([5, 8], dtype=jnp.int32)
    mask = (jnp.arange(L)[None, :] < lens[:, None]).astype(jnp.int32)  # [B, L]

    out = jax.block_until_ready(avg_pool_with_mask(x, mask))
    ref = _reference(x, mask)
    assert out.shape == (B, H)
    assert jnp.allclose(out, ref, atol=1e-5, rtol=1e-5)

    # --- test 2: bf16 input streamed natively, f32 accumulation --------
    xb = x.astype(jnp.bfloat16)
    out_bf = jax.block_until_ready(avg_pool_with_mask(xb, mask))
    ref_bf = _reference(xb, mask)
    assert jnp.allclose(out_bf, ref_bf, atol=1e-3, rtol=1e-3)

    # --- test 3: ragged seq tiling + hidden split + multi-step reduce --
    B3, L3, H3 = 3, 200, 256
    x3 = jax.random.normal(k2, (B3, L3, H3), dtype=jnp.bfloat16)
    lens3 = jnp.array([1, 123, 200], dtype=jnp.int32)
    mask3 = (jnp.arange(L3)[None, :] < lens3[:, None]).astype(jnp.int32)
    # tiny per-buffer budget forces TL=128 (ragged tail) and TH=128 (H split)
    out3 = jax.block_until_ready(
        avg_pool_with_mask(x3, mask3, per_buffer_bytes=64 * 1024))
    ref3 = _reference(x3, mask3)
    assert out3.shape == (B3, H3)
    assert jnp.allclose(out3, ref3, atol=1e-3, rtol=1e-3)

    print("KERNEL_OK")
</pallas_src>

<mosaic_0001>
module attributes {stable_mosaic.version = 11 : i64} {
  func.func @_avg_pool_mask_kernel(%arg0: i32, %arg1: i32, %arg2: i32, %arg3: memref<2x8x32xf32, #tpu.memory_space<vmem>>, %arg4: memref<2x8xf32, #tpu.memory_space<vmem>>, %arg5: memref<2x32xf32, #tpu.memory_space<vmem>>, %arg6: memref<2x1xf32, #tpu.memory_space<vmem>>) attributes {dimension_semantics = [#tpu.dimension_semantics<parallel>, #tpu.dimension_semantics<parallel>, #tpu.dimension_semantics<arbitrary>], iteration_bounds = array<i64: 1, 1, 1>, scalar_prefetch = 0 : i64, scratch_operands = 1 : i64, tpu.core_type = #tpu.core_type<tc>, window_params = [{transform_indices = @transform_0, window_bounds = array<i64: 2, 8, 32>}, {transform_indices = @transform_1, window_bounds = array<i64: 2, 8>}, {transform_indices = @transform_2, window_bounds = array<i64: 2, 32>}]} {
    %c0_i32 = arith.constant 0 : i32
    %0 = arith.cmpi eq, %arg2, %c0_i32 : i32
    %1 = arith.extui %0 : i1 to i32
    %c0_i32_0 = arith.constant 0 : i32
    %2 = arith.cmpi ne, %1, %c0_i32_0 : i32
    scf.if %2 {
      %cst_16 = arith.constant 0.000000e+00 : f32
      %20 = vector.broadcast %cst_16 : f32 to vector<2x32xf32>
      %c0_17 = arith.constant 0 : index
      %c0_18 = arith.constant 0 : index
      %21 = vector.load %arg5[%c0_17, %c0_18] : memref<2x32xf32, #tpu.memory_space<vmem>>, vector<2x32xf32>
      tpu.vector_store %arg5[%c0_17, %c0_18], %20 {strides = array<i32>} : memref<2x32xf32, #tpu.memory_space<vmem>>, vector<2x32xf32>,
      %cst_19 = arith.constant 0.000000e+00 : f32
      %22 = vector.broadcast %cst_19 : f32 to vector<2x1xf32>
      %c0_20 = arith.constant 0 : index
      %c0_21 = arith.constant 0 : index
      %23 = vector.load %arg6[%c0_20, %c0_21] : memref<2x1xf32, #tpu.memory_space<vmem>>, vector<2x1xf32>
      tpu.vector_store %arg6[%c0_20, %c0_21], %22 {strides = array<i32>} : memref<2x1xf32, #tpu.memory_space<vmem>>, vector<2x1xf32>,
    } else {
    }
    %c0 = arith.constant 0 : index
    %c0_1 = arith.constant 0 : index
    %c0_2 = arith.constant 0 : index
    %3 = vector.load %arg3[%c0, %c0_1, %c0_2] : memref<2x8x32xf32, #tpu.memory_space<vmem>>, vector<2x8x32xf32>
    %c0_3 = arith.constant 0 : index
    %c0_4 = arith.constant 0 : index
    %4 = vector.load %arg4[%c0_3, %c0_4] : memref<2x8xf32, #tpu.memory_space<vmem>>, vector<2x8xf32>
    %5 = vector.shape_cast %4 : vector<2x8xf32> to vector<2x8x1xf32>
    %c0_5 = arith.constant 0 : index
    %c0_6 = arith.constant 0 : index
    %6 = vector.load %arg5[%c0_5, %c0_6] : memref<2x32xf32, #tpu.memory_space<vmem>>, vector<2x32xf32>
    %7 = vector.broadcast %5 : vector<2x8x1xf32> to vector<2x8x32xf32>
    %8 = arith.mulf %3, %7 : vector<2x8x32xf32>
    %cst = arith.constant dense<0.000000e+00> : vector<2x32xf32>
    %9 = vector.multi_reduction <add>, %8, %cst [1] : vector<2x8x32xf32> to vector<2x32xf32>
    %10 = arith.addf %6, %9 : vector<2x32xf32>
    %c0_7 = arith.constant 0 : index
    %c0_8 = arith.constant 0 : index
    %11 = vector.load %arg5[%c0_7, %c0_8] : memref<2x32xf32, #tpu.memory_space<vmem>>, vector<2x32xf32>
    tpu.vector_store %arg5[%c0_7, %c0_8], %10 {strides = array<i32>} : memref<2x32xf32, #tpu.memory_space<vmem>>, vector<2x32xf32>,
    %c0_9 = arith.constant 0 : index
    %c0_10 = arith.constant 0 : index
    %12 = vector.load %arg6[%c0_9, %c0_10] : memref<2x1xf32, #tpu.memory_space<vmem>>, vector<2x1xf32>
    %cst_11 = arith.constant dense<0.000000e+00> : vector<2xf32>
    %13 = vector.multi_reduction <add>, %4, %cst_11 [1] : vector<2x8xf32> to vector<2xf32>
    %14 = vector.shape_cast %13 : vector<2xf32> to vector<2x1xf32>
    %15 = arith.addf %12, %14 : vector<2x1xf32>
    %c0_12 = arith.constant 0 : index
    %c0_13 = arith.constant 0 : index
    %16 = vector.load %arg6[%c0_12, %c0_13] : memref<2x1xf32, #tpu.memory_space<vmem>>, vector<2x1xf32>
    tpu.vector_store %arg6[%c0_12, %c0_13], %15 {strides = array<i32>} : memref<2x1xf32, #tpu.memory_space<vmem>>, vector<2x1xf32>,
    %c0_i32_14 = arith.constant 0 : i32
    %17 = arith.cmpi eq, %arg2, %c0_i32_14 : i32
    %18 = arith.extui %17 : i1 to i32
    %c0_i32_15 = arith.constant 0 : i32
    %19 = arith.cmpi ne, %18, %c0_i32_15 : i32
    scf.if %19 {
      %c0_16 = arith.constant 0 : index
      %c0_17 = arith.constant 0 : index
      %20 = vector.load %arg5[%c0_16, %c0_17] : memref<2x32xf32, #tpu.memory_space<vmem>>, vector<2x32xf32>
      %c0_18 = arith.constant 0 : index
      %c0_19 = arith.constant 0 : index
      %21 = vector.load %arg6[%c0_18, %c0_19] : memref<2x1xf32, #tpu.memory_space<vmem>>, vector<2x1xf32>
      %22 = tpu.reciprocal %21 : vector<2x1xf32> -> vector<2x1xf32>
      %23 = vector.broadcast %22 : vector<2x1xf32> to vector<2x32xf32>
      %24 = arith.mulf %20, %23 : vector<2x32xf32>
      %c0_20 = arith.constant 0 : index
      %c0_21 = arith.constant 0 : index
      %25 = vector.load %arg5[%c0_20, %c0_21] : memref<2x32xf32, #tpu.memory_space<vmem>>, vector<2x32xf32>
      tpu.vector_store %arg5[%c0_20, %c0_21], %24 {strides = array<i32>} : memref<2x32xf32, #tpu.memory_space<vmem>>, vector<2x32xf32>,
    } else {
    }
    return
  }
  func.func @transform_0(%arg0: i32, %arg1: i32, %arg2: i32) -> (i32, i32, i32) {
    %c0_i32 = arith.constant 0 : i32
    return %arg0, %arg2, %arg1 : i32, i32, i32
  }
  func.func @transform_1(%arg0: i32, %arg1: i32, %arg2: i32) -> (i32, i32) {
    %c0_i32 = arith.constant 0 : i32
    return %arg0, %arg2 : i32, i32
  }
  func.func @transform_2(%arg0: i32, %arg1: i32, %arg2: i32) -> (i32, i32) {
    %c0_i32 = arith.constant 0 : i32
    return %arg0, %arg1 : i32, i32
  }
}

</mosaic_0001>

<bundles_post_ra>
// kernel: tpu_custom_call.1
= control target key start
LH: loop header
LB: loop body
LE: loop exit
PB: predicated region body
PF: predicated region fallthrough
CT: control target
= control target key end

     0   :  { %7 = vsyncpa [#allocation4], 0  ;;  %s274_s0 = inlined_call_operand.hbm [shape: f32[2,8,32], index: 0, kind: input, shape index: {}]   ;;  %s275_s1 = inlined_call_operand.hbm [shape: f32[2,8], index: 1, kind: input, shape index: {}]   ;;  %s276_s2 = inlined_call_operand.hbm [shape: f32[2,32], index: 2, kind: output, shape index: {}]  }
   0x1   :  { %8 = vsyncpa [#allocation7], 0 }
   0x2   :  { %9 = vsyncpa [#allocation5], 0  ;;  %s14_s11 = sshll.u32 %s274_s0, 4  ;;  %s236_s12 = smov [#allocation3]   ;;  %s15_s11 = int_to_ptr.hbm [resolvable:$true] %s14_s11 }
   0x3   :  { %s16_s13 = sshll.u32 %s236_s12, 4  ;;  %s28_s16 = sshll.u32 %s275_s1, 4  ;;  %s17_s13 = int_to_ptr.vmem [resolvable:$true] %s16_s13  ;;  %s29_s16 = int_to_ptr.hbm [resolvable:$true] %s28_s16 }
   0x4   :  { %s237_s17 = smov 128   ;;  %s238_s18 = smov 8  }
   0x5   :  { %22 = dma.hbm_to_vmem [thread:$0]  %s15_s11, 256, %s17_s13, [#allocation4], %s237_s17, %s237_s17, %s238_s18  }
   0x6   :  { %s239_s19 = smov [#allocation6]  }
   0x7   :  { %s30_s20 = sshll.u32 %s239_s19, 4  ;;  %s31_s20 = int_to_ptr.vmem [resolvable:$true] %s30_s20 }
   0x8   :  { %33 = dma.hbm_to_vmem [thread:$0]  %s29_s16, 32, %s31_s20, [#allocation7]  }
   0x9   :  { %230 = dma.done.wait [#allocation4], 256  }
   0xa   :  { %231 = vsyncadd [#allocation4], 4294967040 }
   0xb   :  { %232 = dma.done.wait [#allocation7], 32  }
   0xc   :  { %233 = vsyncadd [#allocation7], 4294967264  ;;  %v54_v0 = vlaneseq  ;;  %vm48_vm0 = vcmask 1024   ;;  %v240_v1 = vmov 0.0   ;;  %vm94_vm1 = vcmask 58368   ;;  %v51_v11 = vld [vmem:[#allocation3 + $0x8] sm:$0xff] }
   0xd   :  { %49 = vst.msk [vmem:[#allocation2] sm:$0x3] %vm48_vm0, %v240_v1  ;;  %v52_v3 = vld [vmem:[#allocation6] sm:$0x3]  ;;  %v241_v7 = vmov 0   ;;  %vm46_vm2 = vcmask 254976  }
   0xe   :  { %v55_v2 = vshrl.u32 %v54_v0, 7  ;;  %v95_v4 = vsel %vm94_vm1, %v52_v3, 0.0  ;;  %v60_v5 = vperm.slane %v52_v3, 1  ;;  %v53_v6 = vperm.slane %v52_v3, 0  ;;  %47 = vst.msk [vmem:[#allocation8] sm:$0x3] %vm46_vm2, %v240_v1 }
   0xf   :  { %96 = vadd.xlane.f32.xlu0 %v95_v4  ;;  %vm70_vm3 = vcmask 261120   ;;  %v50_v19 = vld [vmem:[#allocation3] sm:$0xff]  ;;  %vm87_vm8 = vcmask 1041409   ;;  %s242_s0 = smov [#allocation8]   ;;  %s134_s23 = sshll.u32 %s276_s2, 4  ;;  %s135_s23 = int_to_ptr.hbm [resolvable:$true] %s134_s23 }
  0x10   :  { %153 = vset.pattern.permute.xlu1 %v55_v2  ;;  %152 = vset.pattern.permute.xlu0 %v55_v2  ;;  %s132_s1 = sshll.u32 %s242_s0, 4  ;;  %s133_s1 = int_to_ptr.vmem [resolvable:$true] %s132_s1 }
  0x14   :  { %v93_v8 = vld [vmem:[#allocation2] sm:$0x3] }
  0x15   :  { %v67_v41 = vld [vmem:[#allocation8] sm:$0x3] }
  0x18   :  { %65 = vperm.xlu1 %153, %v60_v5  }
  0x20   :  { %154 = vset.pattern.permute.xlu1 %v241_v7 }
  0x23   :  { %58 = vperm.xlu0 %152, %v53_v6  }
  0x2b   :  { %155 = vset.pattern.permute.xlu0 %v241_v7 }
  0x82   :  { %v97_v9 = vpop.xlane.xlu0 %96 }
  0x83   :  { %v98_v10 = vadd.f32 %v97_v9, %v93_v8 }
  0x85   :  { %100 = vst.msk [vmem:[#allocation2] sm:$0x3] %vm48_vm0, %v98_v10 }
  0x8a   :  { %v66_v12 = vpop.permute.xlu1 %65 }
  0x8b   :  { %v69_v13 = vmul.f32 %v66_v12, %v51_v11 }
  0x8c   :  { %v105_v15 = vld [vmem:[#allocation2] sm:$0x3] }
  0x8d   :  { %v78_v14 = vsel %vm70_vm3, %v69_v13, 0.0  ;;  %156 = vrcp.f32 %v105_v15  ;;  %v117_v25 = vand.u32 2147483648, %v105_v15  ;;  %v115_v27 = vand.u32 2147483647, %v105_v15 }
  0x8e   :  { %v79_v16 = vrot.slane %v78_v14, 4  ;;  %vm111_vm5 = vweird.f32 %v105_v15 }
  0x8f   :  { %v118_v32 = vor.u32 1.1754944e-38, %v117_v25  ;;  %vm116_vm7 = vcmp.eq.f32.partialorder %v115_v27, 8.507059e+37 }
  0x90   :  { %v80_v17 = vadd.f32 %v79_v16, %v78_v14 }
  0x92   :  { %v81_v21 = vrot.slane %v80_v17, 2 }
  0x93   :  { %v157_v18 = vpop.eup %156 }
  0x94   :  { %v107_v20 = vmul.f32 %v157_v18, %v105_v15  ;;  %vm112_vm4 = vweird.f32 %v157_v18  ;;  %v82_v29 = vadd.f32 %v81_v21, %v80_v17 }
  0x95   :  { %v59_v22 = vpop.permute.xlu0 %58  ;;  %vm113_vm6 = vmor %vm111_vm5, %vm112_vm4 }
  0x96   :  { %v108_v23 = vsub.f32 1.0, %v107_v20  ;;  %v68_v24 = vmul.f32 %v59_v22, %v50_v19  ;;  %v83_v36 = vrot.slane %v82_v29, 1 }
  0x98   :  { %v109_v26 = vmul.f32 %v157_v18, %v108_v23  ;;  %v71_v28 = vsel %vm70_vm3, %v68_v24, 0.0  ;;  %v84_v39 = vadd.f32 %v83_v36, %v82_v29 }
  0x99   :  { %v72_v30 = vrot.slane %v71_v28, 4 }
  0x9a   :  { %v110_v31 = vadd.f32 %v157_v18, %v109_v26 }
  0x9b   :  { %v73_v33 = vadd.f32 %v72_v30, %v71_v28 }
  0x9c   :  { %v114_v34 = vsel %vm113_vm6, %v157_v18, %v110_v31 }
  0x9d   :  { %v119_v35 = vsel %vm116_vm7, %v118_v32, %v114_v34  ;;  %v74_v37 = vrot.slane %v73_v33, 2 }
  0x9e   :  { %122 = vperm.xlu1 %154, %v119_v35  }
  0x9f   :  { %v75_v38 = vadd.f32 %v74_v37, %v73_v33 }
  0xa1   :  { %v76_v40 = vrot.slane %v75_v38, 1 }
  0xa3   :  { %v77_v42 = vadd.f32 %v76_v40, %v75_v38 }
  0xa5   :  { %v88_v43 = vsel %vm87_vm8, %v84_v39, %v77_v42 }
  0xa6   :  { %v90_v44 = vadd.f32 %v88_v43, %v67_v41 }
  0xa8   :  { %92 = vst.msk [vmem:[#allocation8] sm:$0x3] %vm46_vm2, %v90_v44 }
  0xaf   :  { %v104_v46 = vld [vmem:[#allocation8] sm:$0x3] }
 0x110   :  { %v123_v45 = vpop.permute.xlu1 %122 }
 0x111   :  { %v125_v47 = vmul.f32 %v123_v45, %v104_v46 }
 0x113   :  { %126 = vst.msk [vmem:[#allocation8] sm:$0x3] %vm46_vm2, %v125_v47 }
 0x114   :  { %137 = dma.vmem_to_hbm [thread:$0]  %s133_s1, 32, %s135_s23, [#allocation5]  }
 0x115   :  { %234 = dma.done.wait [#allocation5], 32  }
 0x116   :  { %235 = vsyncadd [#allocation5], 4294967264 }
 0x117   :  { %142 = vsyncpa [#allocation4], 1 }
 0x118   :  { %143 = vsyncpa [#allocation7], 1 }
 0x119   :  { %144 = vsyncpa [#allocation5], 1 }

</bundles_post_ra>
